<compile_context>
chip_gen: v6e
topology: v6e:2x2x1
jax: 0.10.0
libtpu: 0.0.40
codegen_flags: <defaults>
</compile_context>

<pallas_src>
from functools import partial

import jax
import jax.numpy as jnp
from jax.experimental import pallas as pl
from jax.experimental.pallas import tpu as pltpu


def _round_up(x, m):
    return ((x + m - 1) // m) * m


def actor_kernel(x_ref, w1_ref, b1_ref, w2_ref, b2_ref, w3_ref, b3_ref,
                 out_ref, *, max_action):
    # x_ref: [TB, S] (bf16), weights bf16, biases f32, out f32 [TB, A_pad]
    x = x_ref[...]
    # Layer 1: MXU dot with f32 accumulation, f32 epilogue.
    h1 = jnp.dot(x, w1_ref[...], preferred_element_type=jnp.float32) + b1_ref[...]
    h1 = jnp.maximum(h1, 0.0).astype(w2_ref.dtype)            # relu, back to MXU dtype
    # Layer 2.
    h2 = jnp.dot(h1, w2_ref[...], preferred_element_type=jnp.float32) + b2_ref[...]
    h2 = jnp.maximum(h2, 0.0).astype(w3_ref.dtype)            # relu
    # Layer 3 (output lanes padded to 128 -> unmasked lane-dense store).
    a = jnp.dot(h2, w3_ref[...], preferred_element_type=jnp.float32) + b3_ref[...]
    out_ref[...] = max_action * jnp.tanh(a)                   # f32 epilogue (EUP tanh)


def actor_forward(state, params, max_action, *, block_b=256,
                  compute_dtype=jnp.bfloat16):
    """Fused Actor forward. state: [B, S] f32. Returns [B, A] f32."""
    B, S = state.shape
    H = params["w1"].shape[1]
    A = params["w3"].shape[1]

    LANE = 128
    A_pad = _round_up(A, LANE)                # lane-dense output slab
    TB = min(block_b, _round_up(B, 8))        # batch tile (>= 1 sublane group)
    B_pad = _round_up(B, TB)
    grid = (B_pad // TB,)

    # Cast MXU operands to bf16 at the boundary; pad batch + output lanes with zeros.
    x = state.astype(compute_dtype)
    if B_pad != B:
        x = jnp.pad(x, ((0, B_pad - B), (0, 0)))
    w1 = params["w1"].astype(compute_dtype)
    w2 = params["w2"].astype(compute_dtype)
    w3 = jnp.pad(params["w3"], ((0, 0), (0, A_pad - A))).astype(compute_dtype)
    b1 = params["b1"].astype(jnp.float32)
    b2 = params["b2"].astype(jnp.float32)
    b3 = jnp.pad(params["b3"], ((0, 0), (0, A_pad - A))).astype(jnp.float32)

    flops = 2 * B_pad * (S * H + H * H + H * A_pad)
    transcendentals = B_pad * A_pad           # tanh
    bytes_accessed = (x.size * x.dtype.itemsize
                      + w1.size * w1.dtype.itemsize
                      + w2.size * w2.dtype.itemsize
                      + w3.size * w3.dtype.itemsize
                      + (b1.size + b2.size + b3.size) * 4
                      + B_pad * A_pad * 4)

    kernel = partial(actor_kernel, max_action=float(max_action))
    out = pl.pallas_call(
        kernel,
        out_shape=jax.ShapeDtypeStruct((B_pad, A_pad), jnp.float32),
        grid=grid,
        in_specs=[
            pl.BlockSpec((TB, S), lambda i: (i, 0)),      # state tile (pipelined)
            pl.BlockSpec((S, H), lambda i: (0, 0)),       # w1 resident
            pl.BlockSpec((1, H), lambda i: (0, 0)),       # b1 resident
            pl.BlockSpec((H, H), lambda i: (0, 0)),       # w2 resident
            pl.BlockSpec((1, H), lambda i: (0, 0)),       # b2 resident
            pl.BlockSpec((H, A_pad), lambda i: (0, 0)),   # w3 (lane-padded) resident
            pl.BlockSpec((1, A_pad), lambda i: (0, 0)),   # b3 (lane-padded) resident
        ],
        out_specs=pl.BlockSpec((TB, A_pad), lambda i: (i, 0)),
        compiler_params=pltpu.CompilerParams(
            dimension_semantics=("parallel",)),           # megacore-shard batch on v7x
        cost_estimate=pl.CostEstimate(
            flops=int(flops),
            transcendentals=int(transcendentals),
            bytes_accessed=int(bytes_accessed)),
    )(x, w1, b1, w2, b2, w3, b3)

    return out[:B, :A]


def init_actor_params(key, state_dim, action_dim, hidden=256):
    """PyTorch-Linear-style init: U(-1/sqrt(fan_in), 1/sqrt(fan_in)).
    Weights stored as [in, out] (transposed vs torch's [out, in])."""
    def linear(key, fan_in, fan_out):
        kw, kb = jax.random.split(key)
        bound = 1.0 / jnp.sqrt(jnp.float32(fan_in))
        w = jax.random.uniform(kw, (fan_in, fan_out), jnp.float32, -bound, bound)
        b = jax.random.uniform(kb, (1, fan_out), jnp.float32, -bound, bound)
        return w, b

    k1, k2, k3 = jax.random.split(key, 3)
    w1, b1 = linear(k1, state_dim, hidden)
    w2, b2 = linear(k2, hidden, hidden)
    w3, b3 = linear(k3, hidden, action_dim)
    return {"w1": w1, "b1": b1, "w2": w2, "b2": b2, "w3": w3, "b3": b3}


def actor_reference(state, params, max_action, compute_dtype=None):
    """Pure-JAX reference. If compute_dtype is given, mimics the kernel's bf16
    MXU operands with f32 accumulation and f32 epilogue."""
    def maybe(x):
        return x.astype(compute_dtype) if compute_dtype is not None else x

    h1 = jnp.dot(maybe(state), maybe(params["w1"]),
                 preferred_element_type=jnp.float32) + params["b1"]
    h1 = jnp.maximum(h1, 0.0)
    h2 = jnp.dot(maybe(h1), maybe(params["w2"]),
                 preferred_element_type=jnp.float32) + params["b2"]
    h2 = jnp.maximum(h2, 0.0)
    a = jnp.dot(maybe(h2), maybe(params["w3"]),
                preferred_element_type=jnp.float32) + params["b3"]
    return max_action * jnp.tanh(a)


if __name__ == "__main__":
    key = jax.random.PRNGKey(0)
    k_params, k_state = jax.random.split(key)

    batch = 2
    state_dim = 16
    action_dim = 8
    max_action = 2.0

    params = init_actor_params(k_params, state_dim, action_dim)
    state = jax.random.normal(k_state, (batch, state_dim), jnp.float32)

    # Jit the whole wrapper so boundary casts/pads fuse with surrounding XLA ops.
    fwd = jax.jit(partial(actor_forward, max_action=max_action))
    out = fwd(state, params)
    out = jax.block_until_ready(out)
    assert out.shape == (batch, action_dim)

    # Exact-semantics check against a reference with identical bf16 MXU operands.
    ref_bf16 = actor_reference(state, params, max_action, compute_dtype=jnp.bfloat16)
    assert jnp.allclose(out, ref_bf16, atol=2e-3, rtol=2e-3), "mismatch vs bf16 reference"

    # Sanity check against the full-f32 reference (bf16 operand rounding only).
    ref_f32 = actor_reference(state, params, max_action)
    assert jnp.allclose(out, ref_f32, atol=5e-2, rtol=5e-2), "mismatch vs f32 reference"

    print("KERNEL_OK")
</pallas_src>

<mosaic_0001>
module attributes {stable_mosaic.version = 11 : i64} {
  func.func @actor_kernel(%arg0: i32, %arg1: memref<8x16xbf16, #tpu.memory_space<vmem>>, %arg2: memref<16x256xbf16, #tpu.memory_space<vmem>>, %arg3: memref<1x256xf32, #tpu.memory_space<vmem>>, %arg4: memref<256x256xbf16, #tpu.memory_space<vmem>>, %arg5: memref<1x256xf32, #tpu.memory_space<vmem>>, %arg6: memref<256x128xbf16, #tpu.memory_space<vmem>>, %arg7: memref<1x128xf32, #tpu.memory_space<vmem>>, %arg8: memref<8x128xf32, #tpu.memory_space<vmem>>) attributes {dimension_semantics = [#tpu.dimension_semantics<parallel>], iteration_bounds = array<i64: 1>, scalar_prefetch = 0 : i64, scratch_operands = 0 : i64, tpu.core_type = #tpu.core_type<tc>, window_params = [{transform_indices = @transform_0, window_bounds = array<i64: 8, 16>}, {pipeline_mode = #tpu.pipeline_mode<synchronous>, transform_indices = @transform_1, window_bounds = array<i64: 16, 256>}, {pipeline_mode = #tpu.pipeline_mode<synchronous>, transform_indices = @transform_2, window_bounds = array<i64: 1, 256>}, {pipeline_mode = #tpu.pipeline_mode<synchronous>, transform_indices = @transform_3, window_bounds = array<i64: 256, 256>}, {pipeline_mode = #tpu.pipeline_mode<synchronous>, transform_indices = @transform_4, window_bounds = array<i64: 1, 256>}, {pipeline_mode = #tpu.pipeline_mode<synchronous>, transform_indices = @transform_5, window_bounds = array<i64: 256, 128>}, {pipeline_mode = #tpu.pipeline_mode<synchronous>, transform_indices = @transform_6, window_bounds = array<i64: 1, 128>}, {transform_indices = @transform_7, window_bounds = array<i64: 8, 128>}]} {
    %c0 = arith.constant 0 : index
    %c0_0 = arith.constant 0 : index
    %0 = vector.load %arg1[%c0, %c0_0] : memref<8x16xbf16, #tpu.memory_space<vmem>>, vector<8x16xbf16>
    %c0_1 = arith.constant 0 : index
    %c0_2 = arith.constant 0 : index
    %1 = vector.load %arg2[%c0_1, %c0_2] : memref<16x256xbf16, #tpu.memory_space<vmem>>, vector<16x256xbf16>
    %cst = arith.constant dense<0.000000e+00> : vector<8x256xf32>
    %2 = tpu.matmul %0, %1, %cst {dimension_numbers = #tpu.dot_dimension_numbers<[1], [0], [0], [1], [0, 0, 1, 1], [], []>} : vector<8x16xbf16>, vector<16x256xbf16>, vector<8x256xf32> -> vector<8x256xf32>
    %c0_3 = arith.constant 0 : index
    %c0_4 = arith.constant 0 : index
    %3 = vector.load %arg3[%c0_3, %c0_4] : memref<1x256xf32, #tpu.memory_space<vmem>>, vector<1x256xf32>
    %4 = vector.broadcast %3 : vector<1x256xf32> to vector<8x256xf32>
    %5 = arith.addf %2, %4 : vector<8x256xf32>
    %cst_5 = arith.constant 0.000000e+00 : f32
    %6 = vector.broadcast %cst_5 : f32 to vector<8x256xf32>
    %7 = arith.maximumf %5, %6 : vector<8x256xf32>
    %8 = arith.truncf %7 : vector<8x256xf32> to vector<8x256xbf16>
    %c0_6 = arith.constant 0 : index
    %c0_7 = arith.constant 0 : index
    %9 = vector.load %arg4[%c0_6, %c0_7] : memref<256x256xbf16, #tpu.memory_space<vmem>>, vector<256x256xbf16>
    %cst_8 = arith.constant dense<0.000000e+00> : vector<8x256xf32>
    %10 = tpu.matmul %8, %9, %cst_8 {dimension_numbers = #tpu.dot_dimension_numbers<[1], [0], [0], [1], [0, 0, 1, 1], [], []>} : vector<8x256xbf16>, vector<256x256xbf16>, vector<8x256xf32> -> vector<8x256xf32>
    %c0_9 = arith.constant 0 : index
    %c0_10 = arith.constant 0 : index
    %11 = vector.load %arg5[%c0_9, %c0_10] : memref<1x256xf32, #tpu.memory_space<vmem>>, vector<1x256xf32>
    %12 = vector.broadcast %11 : vector<1x256xf32> to vector<8x256xf32>
    %13 = arith.addf %10, %12 : vector<8x256xf32>
    %cst_11 = arith.constant 0.000000e+00 : f32
    %14 = vector.broadcast %cst_11 : f32 to vector<8x256xf32>
    %15 = arith.maximumf %13, %14 : vector<8x256xf32>
    %16 = arith.truncf %15 : vector<8x256xf32> to vector<8x256xbf16>
    %c0_12 = arith.constant 0 : index
    %c0_13 = arith.constant 0 : index
    %17 = vector.load %arg6[%c0_12, %c0_13] : memref<256x128xbf16, #tpu.memory_space<vmem>>, vector<256x128xbf16>
    %cst_14 = arith.constant dense<0.000000e+00> : vector<8x128xf32>
    %18 = tpu.matmul %16, %17, %cst_14 {dimension_numbers = #tpu.dot_dimension_numbers<[1], [0], [0], [1], [0, 0, 1, 1], [], []>} : vector<8x256xbf16>, vector<256x128xbf16>, vector<8x128xf32> -> vector<8x128xf32>
    %c0_15 = arith.constant 0 : index
    %c0_16 = arith.constant 0 : index
    %19 = vector.load %arg7[%c0_15, %c0_16] : memref<1x128xf32, #tpu.memory_space<vmem>>, vector<1x128xf32>
    %20 = vector.broadcast %19 : vector<1x128xf32> to vector<8x128xf32>
    %21 = arith.addf %18, %20 : vector<8x128xf32>
    %22 = math.tanh %21 : vector<8x128xf32>
    %cst_17 = arith.constant 2.000000e+00 : f32
    %23 = vector.broadcast %cst_17 : f32 to vector<8x128xf32>
    %24 = arith.mulf %23, %22 : vector<8x128xf32>
    %c0_18 = arith.constant 0 : index
    %c0_19 = arith.constant 0 : index
    %25 = vector.load %arg8[%c0_18, %c0_19] : memref<8x128xf32, #tpu.memory_space<vmem>>, vector<8x128xf32>
    tpu.vector_store %arg8[%c0_18, %c0_19], %24 {strides = array<i32>} : memref<8x128xf32, #tpu.memory_space<vmem>>, vector<8x128xf32>,
    return
  }
  func.func @transform_0(%arg0: i32) -> (i32, i32) {
    %c0_i32 = arith.constant 0 : i32
    %c0_i32_0 = arith.constant 0 : i32
    return %arg0, %c0_i32 : i32, i32
  }
  func.func @transform_1(%arg0: i32) -> (i32, i32) {
    %c0_i32 = arith.constant 0 : i32
    %c0_i32_0 = arith.constant 0 : i32
    %c0_i32_1 = arith.constant 0 : i32
    return %c0_i32, %c0_i32_0 : i32, i32
  }
  func.func @transform_2(%arg0: i32) -> (i32, i32) {
    %c0_i32 = arith.constant 0 : i32
    %c0_i32_0 = arith.constant 0 : i32
    %c0_i32_1 = arith.constant 0 : i32
    return %c0_i32, %c0_i32_0 : i32, i32
  }
  func.func @transform_3(%arg0: i32) -> (i32, i32) {
    %c0_i32 = arith.constant 0 : i32
    %c0_i32_0 = arith.constant 0 : i32
    %c0_i32_1 = arith.constant 0 : i32
    return %c0_i32, %c0_i32_0 : i32, i32
  }
  func.func @transform_4(%arg0: i32) -> (i32, i32) {
    %c0_i32 = arith.constant 0 : i32
    %c0_i32_0 = arith.constant 0 : i32
    %c0_i32_1 = arith.constant 0 : i32
    return %c0_i32, %c0_i32_0 : i32, i32
  }
  func.func @transform_5(%arg0: i32) -> (i32, i32) {
    %c0_i32 = arith.constant 0 : i32
    %c0_i32_0 = arith.constant 0 : i32
    %c0_i32_1 = arith.constant 0 : i32
    return %c0_i32, %c0_i32_0 : i32, i32
  }
  func.func @transform_6(%arg0: i32) -> (i32, i32) {
    %c0_i32 = arith.constant 0 : i32
    %c0_i32_0 = arith.constant 0 : i32
    %c0_i32_1 = arith.constant 0 : i32
    return %c0_i32, %c0_i32_0 : i32, i32
  }
  func.func @transform_7(%arg0: i32) -> (i32, i32) {
    %c0_i32 = arith.constant 0 : i32
    %c0_i32_0 = arith.constant 0 : i32
    return %arg0, %c0_i32 : i32, i32
  }
}

</mosaic_0001>

<bundles_post_ra>
// kernel: actor_forward.1
= control target key start
LH: loop header
LB: loop body
LE: loop exit
PB: predicated region body
PF: predicated region fallthrough
CT: control target
= control target key end

     0   :  { %v676_v1 = vmov 0   ;;  %vm52_vm0 = vcmask 130048   ;;  %v32_v48 = vlaneseq  ;;  %s882_s1 = inlined_call_operand.vmem [shape: bf16[16,256], index: 1, kind: input, shape index: {}]   ;;  %s883_s0 = inlined_call_operand.vmem [shape: bf16[8,16], index: 0, kind: input, shape index: {}]   ;;  %s884_s3 = inlined_call_operand.vmem [shape: bf16[256,256], index: 3, kind: input, shape index: {}]   ;;  %s885_s5 = inlined_call_operand.vmem [shape: bf16[256,128], index: 5, kind: input, shape index: {}]   ;;  %s886_s2 = inlined_call_operand.vmem [shape: f32[1,256], index: 2, kind: input, shape index: {}]   ;;  %s887_s4 = inlined_call_operand.vmem [shape: f32[1,256], index: 4, kind: input, shape index: {}]   ;;  %s888_s6 = inlined_call_operand.vmem [shape: f32[1,128], index: 6, kind: input, shape index: {}]   ;;  %s889_s7 = inlined_call_operand.vmem [shape: f32[8,128], index: 7, kind: output, shape index: {}]  }
   0x1   :  { %v607_v0 = vld [vmem:[%s882_s1 + $0x4] ss:$8 sps:$4 sm:$0xff]   ;;  %88 = vmatprep.mubr.bf16.mxu0 %v676_v1  ;;  %v609_v2 = vld [vmem:[%s882_s1] ss:$8 sps:$4 sm:$0xff]   ;;  %v610_v4 = vld [vmem:[%s884_s3 + $0x74] ss:$8 sps:$4 sm:$0xff]  }
   0x2   :  { %v27_v3 = vld [vmem:[%s883_s0] sm:$0xf]  ;;  %70 = vmatprep.subr.bf16.mxu0 %v607_v0  ;;  %v612_v5 = vld [vmem:[%s884_s3 + $0x70] ss:$8 sps:$4 sm:$0xff]   ;;  %v613_v6 = vld [vmem:[%s884_s3 + $0x64] ss:$8 sps:$4 sm:$0xff]   ;;  %305 = vmatprep.subr.bf16.mxu1 %v610_v4 }
   0x3   :  { %71 = vmatpush1.bf16.msra.mxu0 %v609_v2  ;;  %306 = vmatpush1.bf16.msra.mxu1 %v612_v5  ;;  %v615_v7 = vld [vmem:[%s884_s3 + $0x60] ss:$8 sps:$4 sm:$0xff]   ;;  %v616_v8 = vld [vmem:[%s884_s3 + $0x54] ss:$8 sps:$4 sm:$0xff]   ;;  %v618_v9 = vld [vmem:[%s884_s3 + $0x50] ss:$8 sps:$4 sm:$0xff]  }
   0x4   :  { %307 = vmatprep.subr.bf16.mxu1 %v613_v6  ;;  %v619_v10 = vld [vmem:[%s884_s3 + $0x44] ss:$8 sps:$4 sm:$0xff]   ;;  %v621_v11 = vld [vmem:[%s884_s3 + $0x40] ss:$8 sps:$4 sm:$0xff]   ;;  %v622_v12 = vld [vmem:[%s884_s3 + $0x34] ss:$8 sps:$4 sm:$0xff]  }
   0x5   :  { %v624_v13 = vld [vmem:[%s884_s3 + $0x30] ss:$8 sps:$4 sm:$0xff]   ;;  %v625_v14 = vld [vmem:[%s884_s3 + $0x24] ss:$8 sps:$4 sm:$0xff]   ;;  %v627_v15 = vld [vmem:[%s884_s3 + $0x20] ss:$8 sps:$4 sm:$0xff]  }
   0x6   :  { %534 = vmatmul.mubr.msk.bf16.vlgmr.msra.gmra.mxu0 %vm52_vm0, %v27_v3  ;;  %v628_v16 = vld [vmem:[%s884_s3 + $0x14] ss:$8 sps:$4 sm:$0xff]   ;;  %v630_v17 = vld [vmem:[%s884_s3 + $0x10] ss:$8 sps:$4 sm:$0xff]   ;;  %v631_v18 = vld [vmem:[%s884_s3 + $0x4] ss:$8 sps:$4 sm:$0xff]  }
   0x7   :  { %308 = vmatpush1.bf16.msra.mxu1 %v615_v7  ;;  %v633_v19 = vld [vmem:[%s884_s3] ss:$8 sps:$4 sm:$0xff]   ;;  %v634_v20 = vld [vmem:[%s884_s3 + $0xf4] ss:$8 sps:$4 sm:$0xff]   ;;  %v636_v21 = vld [vmem:[%s884_s3 + $0xf0] ss:$8 sps:$4 sm:$0xff]  }
   0x8   :  { %309 = vmatprep.subr.bf16.mxu1 %v616_v8  ;;  %v637_v22 = vld [vmem:[%s884_s3 + $0xe4] ss:$8 sps:$4 sm:$0xff]   ;;  %v639_v23 = vld [vmem:[%s884_s3 + $0xe0] ss:$8 sps:$4 sm:$0xff]   ;;  %v640_v24 = vld [vmem:[%s884_s3 + $0xd4] ss:$8 sps:$4 sm:$0xff]  }
   0x9   :  { %v642_v25 = vld [vmem:[%s884_s3 + $0xd0] ss:$8 sps:$4 sm:$0xff]   ;;  %v643_v26 = vld [vmem:[%s884_s3 + $0xc4] ss:$8 sps:$4 sm:$0xff]   ;;  %v645_v27 = vld [vmem:[%s884_s3 + $0xc0] ss:$8 sps:$4 sm:$0xff]  }
   0xa   :  { %v646_v28 = vld [vmem:[%s884_s3 + $0xb4] ss:$8 sps:$4 sm:$0xff]   ;;  %v648_v29 = vld [vmem:[%s884_s3 + $0xb0] ss:$8 sps:$4 sm:$0xff]   ;;  %v649_v30 = vld [vmem:[%s884_s3 + $0xa4] ss:$8 sps:$4 sm:$0xff]  }
   0xb   :  { %310 = vmatpush1.bf16.msra.mxu1 %v618_v9  ;;  %v651_v31 = vld [vmem:[%s884_s3 + $0xa0] ss:$8 sps:$4 sm:$0xff]   ;;  %v652_v32 = vld [vmem:[%s884_s3 + $0x94] ss:$8 sps:$4 sm:$0xff]   ;;  %v654_v33 = vld [vmem:[%s884_s3 + $0x90] ss:$8 sps:$4 sm:$0xff]  }
   0xc   :  { %311 = vmatprep.subr.bf16.mxu1 %v619_v10  ;;  %v655_v34 = vld [vmem:[%s884_s3 + $0x84] ss:$8 sps:$4 sm:$0xff]   ;;  %v657_v35 = vld [vmem:[%s884_s3 + $0x80] ss:$8 sps:$4 sm:$0xff]   ;;  %v658_v36 = vld [vmem:[%s885_s5 + $0x78] sm:$0xff]   ;;  %v33_v49 = vshrl.u32 %v32_v48, 7 }
   0xd   :  { %v659_v37 = vld [vmem:[%s885_s5 + $0x38] sm:$0xff]   ;;  %584 = vmatprep.subr.bf16.mxu0 %v658_v36  ;;  %v660_v38 = vld [vmem:[%s885_s5 + $0x70] sm:$0xff]   ;;  %v662_v40 = vld [vmem:[%s885_s5 + $0x68] sm:$0xff]  }
   0xe   :  { %585 = vmatpush3.bf16.msra.mxu0 %v659_v37  ;;  %v661_v39 = vld [vmem:[%s885_s5 + $0x30] sm:$0xff]   ;;  %v663_v41 = vld [vmem:[%s885_s5 + $0x28] sm:$0xff]   ;;  %v664_v42 = vld [vmem:[%s885_s5 + $0x60] sm:$0xff]   ;;  %v34_v50 = vsub.s32 0, %v33_v49  ;;  %v38_v52 = vsub.s32 1, %v33_v49 }
   0xf   :  { %312 = vmatpush1.bf16.msra.mxu1 %v621_v11  ;;  %586 = vmatprep.subr.bf16.mxu0 %v660_v38  ;;  %v665_v43 = vld [vmem:[%s885_s5 + $0x20] sm:$0xff]   ;;  %v666_v44 = vld [vmem:[%s885_s5 + $0x58] sm:$0xff]   ;;  %v668_v46 = vld [vmem:[%s885_s5 + $0x50] sm:$0xff]  }
  0x10   :  { %313 = vmatprep.subr.bf16.mxu1 %v622_v12  ;;  %v667_v45 = vld [vmem:[%s885_s5 + $0x18] sm:$0xff]   ;;  %v669_v47 = vld [vmem:[%s885_s5 + $0x10] sm:$0xff]   ;;  %v30_v51 = vld [vmem:[%s886_s2] sm:$0x3] }
  0x11   :  { %v35_v53 = vrot.slane %v30_v51, %v34_v50  ;;  %v39_v54 = vrot.slane %v30_v51, %v38_v52  ;;  %v670_v1 = vld [vmem:[%s885_s5 + $0x48] sm:$0xff]   ;;  %v672_v3 = vld [vmem:[%s885_s5 + $0x40] sm:$0xff]  }
  0x12   :  { %587 = vmatpush3.bf16.msra.mxu0 %v661_v39  ;;  %v671_v2 = vld [vmem:[%s885_s5 + $0x8] sm:$0xff]   ;;  %v673_v4 = vld [vmem:[%s885_s5] sm:$0xff]  }
  0x13   :  { %314 = vmatpush1.bf16.msra.mxu1 %v624_v13  ;;  %588 = vmatprep.subr.bf16.mxu0 %v662_v40  ;;  %v133_v5 = vld [vmem:[%s887_s4] sm:$0x3] }
  0x14   :  { %315 = vmatprep.subr.bf16.mxu1 %v625_v14  ;;  %v138_v6 = vrot.slane %v133_v5, %v34_v50  ;;  %v142_v7 = vrot.slane %v133_v5, %v38_v52 }
  0x16   :  { %589 = vmatpush3.bf16.msra.mxu0 %v663_v41 }
  0x17   :  { %316 = vmatpush1.bf16.msra.mxu1 %v627_v15  ;;  %590 = vmatprep.subr.bf16.mxu0 %v664_v42 }
  0x18   :  { %317 = vmatprep.subr.bf16.mxu1 %v628_v16 }
  0x1a   :  { %591 = vmatpush3.bf16.msra.mxu0 %v665_v43 }
  0x1b   :  { %318 = vmatpush1.bf16.msra.mxu1 %v630_v17  ;;  %592 = vmatprep.subr.bf16.mxu0 %v666_v44 }
  0x1c   :  { %319 = vmatprep.subr.bf16.mxu1 %v631_v18 }
  0x1e   :  { %593 = vmatpush3.bf16.msra.mxu0 %v667_v45 }
  0x1f   :  { %320 = vmatpush1.bf16.msra.mxu1 %v633_v19  ;;  %594 = vmatprep.subr.bf16.mxu0 %v668_v46  ;;  %v567_v19 = vld [vmem:[%s888_s6] ss:$0 sm:$0xff] }
  0x20   :  { %321 = vmatprep.subr.bf16.mxu1 %v634_v20 }
  0x22   :  { %595 = vmatpush3.bf16.msra.mxu0 %v669_v47 }
  0x23   :  { %322 = vmatpush2.bf16.msra.mxu1 %v636_v21  ;;  %596 = vmatprep.subr.bf16.mxu0 %v670_v1 }
  0x24   :  { %323 = vmatprep.subr.bf16.mxu1 %v637_v22 }
  0x26   :  { %597 = vmatpush3.bf16.msra.mxu0 %v671_v2 }
  0x27   :  { %324 = vmatpush2.bf16.msra.mxu1 %v639_v23  ;;  %598 = vmatprep.subr.bf16.mxu0 %v672_v3 }
  0x28   :  { %325 = vmatprep.subr.bf16.mxu1 %v640_v24 }
  0x2a   :  { %599 = vmatpush3.bf16.msra.mxu0 %v673_v4 }
  0x2b   :  { %326 = vmatpush2.bf16.msra.mxu1 %v642_v25 }
  0x2c   :  { %327 = vmatprep.subr.bf16.mxu1 %v643_v26 }
  0x2f   :  { %328 = vmatpush2.bf16.msra.mxu1 %v645_v27 }
  0x30   :  { %329 = vmatprep.subr.bf16.mxu1 %v646_v28 }
  0x33   :  { %330 = vmatpush2.bf16.msra.mxu1 %v648_v29 }
  0x34   :  { %331 = vmatprep.subr.bf16.mxu1 %v649_v30 }
  0x37   :  { %332 = vmatpush2.bf16.msra.mxu1 %v651_v31 }
  0x38   :  { %333 = vmatprep.subr.bf16.mxu1 %v652_v32 }
  0x3b   :  { %334 = vmatpush2.bf16.msra.mxu1 %v654_v33 }
  0x3c   :  { %335 = vmatprep.subr.bf16.mxu1 %v655_v34 }
  0x3f   :  { %336 = vmatpush2.bf16.msra.mxu1 %v657_v35 }
  0xc6   :  { %v90_v55 = vpop.f32.mrf.mxu0 }
  0xc7   :  { %v91_v56 = vadd.f32 %v90_v55, %v35_v53 }
  0xc8   :  { %v92_v57 = vpop.f32.mrf.mxu0 }
  0xc9   :  { %v93_v58 = vadd.f32 %v92_v57, %v39_v54  ;;  %v97_v59 = vmax.f32 %v91_v56, 0.0 }
  0xca   :  { %v94_v60 = vpop.f32.mrf.mxu0 }
  0xcb   :  { %v98_v61 = vmax.f32 %v93_v58, 0.0  ;;  %v99_v0 = vpack.c.bf16 %v97_v59, %v97_v59 }
  0xcc   :  { %v95_v62 = vpop.f32.mrf.mxu0 }
  0xcd   :  { %v100_v63 = vpack.c.bf16 %v98_v61, %v98_v61 }
  0xcf   :  { %337 = vmatprep.mubr.bf16.mxu1 %v100_v63 }
  0xd0   :  { %338 = vmatmul.mubr.bf16.vlgmr.msra.gmra.mxu1 %v99_v0 }
 0x190   :  { %v339_v8 = vpop.f32.mrf.mxu1 }
 0x191   :  { %v340_v9 = vadd.f32 %v339_v8, %v138_v6 }
 0x192   :  { %v341_v10 = vpop.f32.mrf.mxu1 }
 0x193   :  { %v342_v11 = vadd.f32 %v341_v10, %v142_v7  ;;  %v346_v12 = vmax.f32 %v340_v9, 0.0 }
 0x194   :  { %v343_v13 = vpop.f32.mrf.mxu1 }
 0x195   :  { %v347_v14 = vmax.f32 %v342_v11, 0.0  ;;  %v348_v17 = vpack.c.bf16 %v346_v12, %v346_v12 }
 0x196   :  { %v344_v15 = vpop.f32.mrf.mxu1 }
 0x197   :  { %v349_v16 = vpack.c.bf16 %v347_v14, %v347_v14 }
 0x199   :  { %517 = vmatprep.mubr.bf16.mxu0 %v349_v16 }
 0x19a   :  { %518 = vmatmul.mubr.bf16.vlgmr.msra.gmra.mxu0 %v348_v17 }
 0x25a   :  { %v600_v18 = vpop.f32.mrf.mxu0 }
 0x25c   :  { %v601_v20 = vpop.f32.mrf.mxu0 }
 0x25d   :  { %v602_v21 = vadd.f32 %v601_v20, %v600_v18 }
 0x25e   :  { %v603_v22 = vpop.f32.mrf.mxu0 }
 0x25f   :  { %v520_v23 = vadd.f32 %v602_v21, %v567_v19 }
 0x260   :  { %v604_v24 = vpop.f32.mrf.mxu0 }
 0x261   :  { %674 = vtanh.f32 %v520_v23 }
 0x26e   :  { %v675_v25 = vpop.eup %674 }
 0x26f   :  { %v526_v26 = vmul.f32 2.0, %v675_v25 }
 0x271   :  { %527 = vst [vmem:[%s889_s7] sm:$0xff] %v526_v26 }

</bundles_post_ra>
